<compile_context>
chip_gen: v6e
topology: v6e:2x2x1
jax: 0.10.0
libtpu: 0.0.40
codegen_flags: <defaults>
</compile_context>

<pallas_src>
import functools

import jax
import jax.numpy as jnp
from jax.experimental import pallas as pl
from jax.experimental.pallas import tpu as pltpu


_GELU_C = 0.7978845608028654  # sqrt(2/pi)


def _round_up(a: int, b: int) -> int:
    return ((a + b - 1) // b) * b


def _round_down(a: int, b: int) -> int:
    return max(b, (a // b) * b)


def _vmem_budget_bytes() -> int:
    """Per-core VMEM budget with headroom for Mosaic-internal scratch."""
    cap = None
    try:
        cap = int(pltpu.get_tpu_info().vmem_capacity_bytes)
    except Exception:
        cap = None
    if not cap:
        kind = ""
        try:
            kind = jax.devices()[0].device_kind.lower()
        except Exception:
            pass
        cap = (64 << 20) if "v7" in kind else (128 << 20)
    # ~52 MiB on v7x (64 MiB physical), ~105 MiB on v5e/v6e (128 MiB physical).
    return max(32 << 20, min(cap - (12 << 20), int(cap * 0.82)))


def _gelu_compute_dtype(compute_dtype):
    """bf16 GELU on v6e/v7x (bf16 VPU/EUP), f32 otherwise (incl. v5e)."""
    if compute_dtype != jnp.bfloat16:
        return jnp.float32
    kind = ""
    try:
        kind = jax.devices()[0].device_kind.lower()
    except Exception:
        pass
    if "v5 lite" in kind or "v5e" in kind or "v5litepod" in kind:
        return jnp.float32
    return jnp.bfloat16


def _gelu_tanh(h, dtype):
    # GELU(approximate='tanh'): 0.5*h*(1 + tanh(sqrt(2/pi)*(h + 0.044715*h^3)))
    h = h.astype(dtype)
    return 0.5 * h * (1.0 + jnp.tanh(_GELU_C * (h + 0.044715 * (h * h * h))))


def _pick_th(H: int, th_req: int) -> int:
    """Largest multiple of 128 that divides H and is <= th_req (else H)."""
    th_req = max(128, min(th_req, H))
    if H % 128 != 0:
        return H
    best = None
    t = 128
    while t <= th_req:
        if H % t == 0:
            best = t
        t += 128
    return best if best is not None else H


def _resident_footprint(tm, E, H, xsize, wsize, gsize):
    return (2 * (E * H + H * E) * wsize   # weights (conservatively 2-buffered)
            + 2 * (H + E) * wsize         # biases
            + 2 * tm * E * xsize          # x tiles (double buffer)
            + 2 * tm * E * xsize          # out tiles (double buffer)
            + tm * H * 4                  # f32 c_fc result
            + tm * H * gsize              # GELU result in weight dtype
            + tm * E * 4)                 # f32 c_proj result


def _tiled_footprint(tm, th, E, H, xsize, wsize, gsize):
    return (2 * tm * E * xsize            # x tiles
            + 2 * E * th * wsize          # W_fc^T slices (double buffer)
            + 2 * th * E * wsize          # W_proj^T slices (double buffer)
            + 2 * (H + E) * wsize         # biases (resident)
            + 2 * tm * E * xsize          # out tiles
            + tm * E * 4                  # f32 accumulator scratch
            + tm * th * 4                 # f32 c_fc result
            + tm * th * gsize)            # GELU result in weight dtype


# ----------------------------------------------------------------------------
# Kernels
# ----------------------------------------------------------------------------
def _mlp_resident_kernel(x_ref, wfc_ref, bfc_ref, wproj_ref, bproj_ref, o_ref,
                         *, gelu_dtype):
    # x_ref:     (tm, E)   row tile
    # wfc_ref:   (E, H)    full W_fc^T   (VMEM-resident, constant index map)
    # bfc_ref:   (1, H)    full b_fc
    # wproj_ref: (H, E)    full W_proj^T (VMEM-resident)
    # bproj_ref: (1, E)    b_proj
    x = x_ref[...]
    h = jnp.dot(x, wfc_ref[...], preferred_element_type=jnp.float32)
    h = h + bfc_ref[...].astype(jnp.float32)
    g = _gelu_tanh(h, gelu_dtype)
    out = jnp.dot(g.astype(wproj_ref.dtype), wproj_ref[...],
                  preferred_element_type=jnp.float32)
    o_ref[...] = (out + bproj_ref[...].astype(jnp.float32)).astype(o_ref.dtype)


def _mlp_htiled_kernel(x_ref, wfc_ref, bfc_ref, wproj_ref, bproj_ref, o_ref,
                       acc_ref, *, th, gelu_dtype):
    # Fallback: hidden dim tiled (grid axis 1, "arbitrary"), f32 accumulator
    # resident across the reduction; b_fc fully resident, sliced in-kernel.
    h_idx = pl.program_id(1)

    @pl.when(h_idx == 0)
    def _zero_acc():
        acc_ref[...] = jnp.zeros_like(acc_ref)

    x = x_ref[...]
    h = jnp.dot(x, wfc_ref[...], preferred_element_type=jnp.float32)
    start = h_idx * th
    if th % 128 == 0:
        start = pl.multiple_of(start, 128)
    h = h + bfc_ref[:, pl.ds(start, th)].astype(jnp.float32)
    g = _gelu_tanh(h, gelu_dtype)
    acc_ref[...] += jnp.dot(g.astype(wproj_ref.dtype), wproj_ref[...],
                            preferred_element_type=jnp.float32)

    @pl.when(h_idx == pl.num_programs(1) - 1)
    def _finalize():
        o_ref[...] = (acc_ref[...]
                      + bproj_ref[...].astype(jnp.float32)).astype(o_ref.dtype)


# ----------------------------------------------------------------------------
# Wrapper
# ----------------------------------------------------------------------------
@functools.partial(jax.jit, static_argnames=("tm", "th", "force_tiled"))
def mlp_pallas(x, wfc_t, bfc, wproj_t, bproj, *, tm=512, th=None,
               force_tiled=False):
    """GPT-2 MLP forward.

    x:       (B, T, E)
    wfc_t:   (E, 4E)   = PyTorch c_fc.weight.T   (pre-transposed, done once)
    bfc:     (4E,)
    wproj_t: (4E, E)   = PyTorch c_proj.weight.T (pre-transposed, done once)
    bproj:   (E,)
    """
    B, T, E = x.shape
    H = wfc_t.shape[1]
    assert wfc_t.shape == (E, H) and wproj_t.shape == (H, E)
    assert bfc.shape == (H,) and bproj.shape == (E,)
    M = B * T

    xsize = jnp.dtype(x.dtype).itemsize
    wsize = jnp.dtype(wfc_t.dtype).itemsize
    gsize = jnp.dtype(wproj_t.dtype).itemsize
    gelu_dtype = _gelu_compute_dtype(x.dtype)
    budget = _vmem_budget_bytes()

    # Row tile: multiple of sublane packing (8 for f32, 16 for bf16).
    row_align = 16 if x.dtype == jnp.bfloat16 else 8
    tm = max(row_align, min(tm, _round_up(M, row_align)))
    tm = _round_up(tm, row_align)
    # Prefer >=2 row tiles when possible so the "parallel" axis can shard
    # across TensorCores (v7x megacore).
    if tm >= M and M >= 2 * row_align:
        tm = _round_up((M + 1) // 2, row_align)

    bfc2 = bfc.reshape(1, H)
    bproj2 = bproj.reshape(1, E)

    use_resident = (not force_tiled) and (
        _resident_footprint(row_align, E, H, xsize, wsize, gsize) <= budget)

    if use_resident:
        # ---- weights fully VMEM-resident, single grid axis over rows ----
        while (tm > row_align and
               _resident_footprint(tm, E, H, xsize, wsize, gsize) > budget):
            tm = _round_down(tm // 2, row_align)
        M_pad = _round_up(M, tm)
        x2 = x.reshape(M, E)
        if M_pad != M:
            x2 = jnp.pad(x2, ((0, M_pad - M), (0, 0)))

        kernel = functools.partial(_mlp_resident_kernel, gelu_dtype=gelu_dtype)
        out = pl.pallas_call(
            kernel,
            out_shape=jax.ShapeDtypeStruct((M_pad, E), x.dtype),
            grid_spec=pltpu.PrefetchScalarGridSpec(
                num_scalar_prefetch=0,
                grid=(M_pad // tm,),
                in_specs=[
                    pl.BlockSpec((tm, E), lambda i: (i, 0)),   # x row tile
                    pl.BlockSpec((E, H), lambda i: (0, 0)),    # W_fc^T resident
                    pl.BlockSpec((1, H), lambda i: (0, 0)),    # b_fc resident
                    pl.BlockSpec((H, E), lambda i: (0, 0)),    # W_proj^T resident
                    pl.BlockSpec((1, E), lambda i: (0, 0)),    # b_proj
                ],
                out_specs=pl.BlockSpec((tm, E), lambda i: (i, 0)),
            ),
            compiler_params=pltpu.CompilerParams(
                dimension_semantics=("parallel",),
                vmem_limit_bytes=budget,
            ),
        )(x2, wfc_t, bfc2, wproj_t, bproj2)
        return out[:M].reshape(B, T, E)

    # ---- fallback: hidden-dim tiled reduction (weights too large for VMEM) --
    th_sel = _pick_th(H, th if th is not None else 1536)
    while _tiled_footprint(tm, th_sel, E, H, xsize, wsize, gsize) > budget:
        if th_sel > 128:
            new_th = _pick_th(H, max(128, th_sel // 2))
            if new_th < th_sel:
                th_sel = new_th
                continue
        if tm > row_align:
            tm = _round_down(tm // 2, row_align)
            continue
        break
    M_pad = _round_up(M, tm)
    x2 = x.reshape(M, E)
    if M_pad != M:
        x2 = jnp.pad(x2, ((0, M_pad - M), (0, 0)))

    kernel = functools.partial(_mlp_htiled_kernel, th=th_sel,
                               gelu_dtype=gelu_dtype)
    out = pl.pallas_call(
        kernel,
        out_shape=jax.ShapeDtypeStruct((M_pad, E), x.dtype),
        grid_spec=pltpu.PrefetchScalarGridSpec(
            num_scalar_prefetch=0,
            grid=(M_pad // tm, H // th_sel),
            in_specs=[
                pl.BlockSpec((tm, E), lambda i, h: (i, 0)),       # x row tile
                pl.BlockSpec((E, th_sel), lambda i, h: (0, h)),   # W_fc^T slice
                pl.BlockSpec((1, H), lambda i, h: (0, 0)),        # b_fc resident
                pl.BlockSpec((th_sel, E), lambda i, h: (h, 0)),   # W_proj^T slice
                pl.BlockSpec((1, E), lambda i, h: (0, 0)),        # b_proj
            ],
            out_specs=pl.BlockSpec((tm, E), lambda i, h: (i, 0)),
            scratch_shapes=[pltpu.VMEM((tm, E), jnp.float32)],
        ),
        compiler_params=pltpu.CompilerParams(
            dimension_semantics=("parallel", "arbitrary"),
            vmem_limit_bytes=budget,
        ),
    )(x2, wfc_t, bfc2, wproj_t, bproj2)
    return out[:M].reshape(B, T, E)


# ----------------------------------------------------------------------------
# Reference + test harness
# ----------------------------------------------------------------------------
def mlp_reference(x, wfc_t, bfc, wproj_t, bproj):
    x32 = x.astype(jnp.float32)
    h = x32 @ wfc_t.astype(jnp.float32) + bfc.astype(jnp.float32)
    g = 0.5 * h * (1.0 + jnp.tanh(_GELU_C * (h + 0.044715 * h ** 3)))
    return g @ wproj_t.astype(jnp.float32) + bproj.astype(jnp.float32)


def _make_params(key, E, H, dtype):
    k1, k2, k3, k4 = jax.random.split(key, 4)
    # PyTorch nn.Linear layout is (out, in); transpose ONCE here, outside the
    # hot path, so the kernel consumes (in, out) weights directly.
    w_fc = jax.random.normal(k1, (H, E), dtype=jnp.float32) * 0.02
    b_fc = jax.random.normal(k2, (H,), dtype=jnp.float32) * 0.02
    w_proj = jax.random.normal(k3, (E, H), dtype=jnp.float32) * 0.02
    b_proj = jax.random.normal(k4, (E,), dtype=jnp.float32) * 0.02
    return (w_fc.T.astype(dtype), b_fc.astype(dtype),
            w_proj.T.astype(dtype), b_proj.astype(dtype))


if __name__ == "__main__":
    key = jax.random.PRNGKey(0)

    # --- Test 1: toy GPT-2-like config (batch=2, seq=8, n_embd=32), f32 -----
    B, T, E = 2, 8, 32
    H = 4 * E
    kx, kp = jax.random.split(key)
    x = jax.random.normal(kx, (B, T, E), dtype=jnp.float32)
    params = _make_params(kp, E, H, jnp.float32)
    out = jax.block_until_ready(mlp_pallas(x, *params))
    ref = mlp_reference(x.reshape(-1, E), *params).reshape(B, T, E)
    assert out.shape == (B, T, E)
    assert jnp.allclose(out, ref, atol=1e-4, rtol=1e-4)

    # --- Test 2: multi-row-tile grid with ragged remainder, f32, resident ---
    B2, T2, E2 = 2, 160, 128
    H2 = 4 * E2
    kx2, kp2 = jax.random.split(jax.random.PRNGKey(1))
    x2 = jax.random.normal(kx2, (B2, T2, E2), dtype=jnp.float32)
    p2 = _make_params(kp2, E2, H2, jnp.float32)
    out2 = jax.block_until_ready(mlp_pallas(x2, *p2, tm=128))
    ref2 = mlp_reference(x2.reshape(-1, E2), *p2).reshape(B2, T2, E2)
    assert jnp.allclose(out2, ref2, atol=1e-3, rtol=1e-3)

    # --- Test 3: bf16 operands (MXU fast path), f32 accumulation ------------
    xb = x2.astype(jnp.bfloat16)
    pb = tuple(p.astype(jnp.bfloat16) for p in p2)
    out3 = jax.block_until_ready(mlp_pallas(xb, *pb, tm=128))
    ref3 = mlp_reference(xb.reshape(-1, E2), *pb).reshape(B2, T2, E2)
    assert out3.dtype == jnp.bfloat16
    assert jnp.allclose(out3.astype(jnp.float32), ref3, atol=3e-2, rtol=1e-1)

    # --- Test 4: forced H-tiled fallback (f32 accumulator over reduction) ---
    out4 = jax.block_until_ready(
        mlp_pallas(x2, *p2, tm=128, th=128, force_tiled=True))
    assert jnp.allclose(out4, ref2, atol=1e-3, rtol=1e-3)

    print("KERNEL_OK")
</pallas_src>

<mosaic_0001>
module attributes {stable_mosaic.version = 11 : i64} {
  func.func @_mlp_resident_kernel(%arg0: i32, %arg1: memref<8x32xf32, #tpu.memory_space<vmem>>, %arg2: memref<32x128xf32, #tpu.memory_space<vmem>>, %arg3: memref<1x128xf32, #tpu.memory_space<vmem>>, %arg4: memref<128x32xf32, #tpu.memory_space<vmem>>, %arg5: memref<1x32xf32, #tpu.memory_space<vmem>>, %arg6: memref<8x32xf32, #tpu.memory_space<vmem>>) attributes {dimension_semantics = [#tpu.dimension_semantics<parallel>], iteration_bounds = array<i64: 2>, scalar_prefetch = 0 : i64, scratch_operands = 0 : i64, tpu.core_type = #tpu.core_type<tc>, window_params = [{transform_indices = @transform_0, window_bounds = array<i64: 8, 32>}, {pipeline_mode = #tpu.pipeline_mode<synchronous>, transform_indices = @transform_1, window_bounds = array<i64: 32, 128>}, {pipeline_mode = #tpu.pipeline_mode<synchronous>, transform_indices = @transform_2, window_bounds = array<i64: 1, 128>}, {pipeline_mode = #tpu.pipeline_mode<synchronous>, transform_indices = @transform_3, window_bounds = array<i64: 128, 32>}, {pipeline_mode = #tpu.pipeline_mode<synchronous>, transform_indices = @transform_4, window_bounds = array<i64: 1, 32>}, {transform_indices = @transform_5, window_bounds = array<i64: 8, 32>}]} {
    %c0 = arith.constant 0 : index
    %c0_0 = arith.constant 0 : index
    %0 = vector.load %arg1[%c0, %c0_0] : memref<8x32xf32, #tpu.memory_space<vmem>>, vector<8x32xf32>
    %c0_1 = arith.constant 0 : index
    %c0_2 = arith.constant 0 : index
    %1 = vector.load %arg2[%c0_1, %c0_2] : memref<32x128xf32, #tpu.memory_space<vmem>>, vector<32x128xf32>
    %cst = arith.constant dense<0.000000e+00> : vector<8x128xf32>
    %2 = tpu.matmul %0, %1, %cst {dimension_numbers = #tpu.dot_dimension_numbers<[1], [0], [0], [1], [0, 0, 1, 1], [], []>} : vector<8x32xf32>, vector<32x128xf32>, vector<8x128xf32> -> vector<8x128xf32>
    %c0_3 = arith.constant 0 : index
    %c0_4 = arith.constant 0 : index
    %3 = vector.load %arg3[%c0_3, %c0_4] : memref<1x128xf32, #tpu.memory_space<vmem>>, vector<1x128xf32>
    %4 = vector.broadcast %3 : vector<1x128xf32> to vector<8x128xf32>
    %5 = arith.addf %2, %4 : vector<8x128xf32>
    %cst_5 = arith.constant 5.000000e-01 : f32
    %6 = vector.broadcast %cst_5 : f32 to vector<8x128xf32>
    %7 = arith.mulf %6, %5 : vector<8x128xf32>
    %8 = arith.mulf %5, %5 : vector<8x128xf32>
    %9 = arith.mulf %8, %5 : vector<8x128xf32>
    %cst_6 = arith.constant 4.471500e-02 : f32
    %10 = vector.broadcast %cst_6 : f32 to vector<8x128xf32>
    %11 = arith.mulf %10, %9 : vector<8x128xf32>
    %12 = arith.addf %5, %11 : vector<8x128xf32>
    %cst_7 = arith.constant 0.797884583 : f32
    %13 = vector.broadcast %cst_7 : f32 to vector<8x128xf32>
    %14 = arith.mulf %13, %12 : vector<8x128xf32>
    %15 = math.tanh %14 : vector<8x128xf32>
    %cst_8 = arith.constant 1.000000e+00 : f32
    %16 = vector.broadcast %cst_8 : f32 to vector<8x128xf32>
    %17 = arith.addf %16, %15 : vector<8x128xf32>
    %18 = arith.mulf %7, %17 : vector<8x128xf32>
    %c0_9 = arith.constant 0 : index
    %c0_10 = arith.constant 0 : index
    %19 = vector.load %arg4[%c0_9, %c0_10] : memref<128x32xf32, #tpu.memory_space<vmem>>, vector<128x32xf32>
    %cst_11 = arith.constant dense<0.000000e+00> : vector<8x32xf32>
    %20 = tpu.matmul %18, %19, %cst_11 {dimension_numbers = #tpu.dot_dimension_numbers<[1], [0], [0], [1], [0, 0, 1, 1], [], []>} : vector<8x128xf32>, vector<128x32xf32>, vector<8x32xf32> -> vector<8x32xf32>
    %c0_12 = arith.constant 0 : index
    %c0_13 = arith.constant 0 : index
    %21 = vector.load %arg5[%c0_12, %c0_13] : memref<1x32xf32, #tpu.memory_space<vmem>>, vector<1x32xf32>
    %22 = vector.broadcast %21 : vector<1x32xf32> to vector<8x32xf32>
    %23 = arith.addf %20, %22 : vector<8x32xf32>
    %c0_14 = arith.constant 0 : index
    %c0_15 = arith.constant 0 : index
    %24 = vector.load %arg6[%c0_14, %c0_15] : memref<8x32xf32, #tpu.memory_space<vmem>>, vector<8x32xf32>
    tpu.vector_store %arg6[%c0_14, %c0_15], %23 {strides = array<i32>} : memref<8x32xf32, #tpu.memory_space<vmem>>, vector<8x32xf32>,
    return
  }
  func.func @transform_0(%arg0: i32) -> (i32, i32) {
    %c0_i32 = arith.constant 0 : i32
    %c0_i32_0 = arith.constant 0 : i32
    return %arg0, %c0_i32 : i32, i32
  }
  func.func @transform_1(%arg0: i32) -> (i32, i32) {
    %c0_i32 = arith.constant 0 : i32
    %c0_i32_0 = arith.constant 0 : i32
    %c0_i32_1 = arith.constant 0 : i32
    return %c0_i32, %c0_i32_0 : i32, i32
  }
  func.func @transform_2(%arg0: i32) -> (i32, i32) {
    %c0_i32 = arith.constant 0 : i32
    %c0_i32_0 = arith.constant 0 : i32
    %c0_i32_1 = arith.constant 0 : i32
    return %c0_i32, %c0_i32_0 : i32, i32
  }
  func.func @transform_3(%arg0: i32) -> (i32, i32) {
    %c0_i32 = arith.constant 0 : i32
    %c0_i32_0 = arith.constant 0 : i32
    %c0_i32_1 = arith.constant 0 : i32
    return %c0_i32, %c0_i32_0 : i32, i32
  }
  func.func @transform_4(%arg0: i32) -> (i32, i32) {
    %c0_i32 = arith.constant 0 : i32
    %c0_i32_0 = arith.constant 0 : i32
    %c0_i32_1 = arith.constant 0 : i32
    return %c0_i32, %c0_i32_0 : i32, i32
  }
  func.func @transform_5(%arg0: i32) -> (i32, i32) {
    %c0_i32 = arith.constant 0 : i32
    %c0_i32_0 = arith.constant 0 : i32
    return %arg0, %c0_i32 : i32, i32
  }
}

</mosaic_0001>

<bundles_post_ra>
// kernel: mlp_pallas.1
= control target key start
LH: loop header
LB: loop body
LE: loop exit
PB: predicated region body
PF: predicated region fallthrough
CT: control target
= control target key end

     0   :  { %10 = vsyncpa [#allocation3], 0  ;;  %s884_s0 = inlined_call_operand.vmem [shape: f32[16,32], index: 0, kind: input, shape index: {}]   ;;  %s885_s1 = inlined_call_operand.vmem [shape: f32[32,128], index: 1, kind: input, shape index: {}]   ;;  %s886_s2 = inlined_call_operand.vmem [shape: f32[1,128], index: 2, kind: input, shape index: {}]   ;;  %s887_s3 = inlined_call_operand.vmem [shape: f32[128,32], index: 3, kind: input, shape index: {}]   ;;  %s888_s4 = inlined_call_operand.vmem [shape: f32[1,32], index: 4, kind: input, shape index: {}]   ;;  %s889_s5 = inlined_call_operand.hbm [shape: f32[16,32], index: 5, kind: output, shape index: {}]  }
   0x1   :  { %12 = vsyncpa [#allocation3 + $0x1], 0  ;;  %s701_s18 = smov 0   ;;  %s703_s19 = smov 0  }
   0x2   :  { %s705_s20 = smov 0   ;;  %s707_s21 = smov 0  }
   0x3 LB: > { %s722_s22 = sadd.s32 4294967295, %s666_s21   ;;  %s482_s23 = sadd.s32 4294967294, %s666_s21   ;;  %s666_s21 = sphi %s707_s21, %s895_s21   ;;  %s662_s20 = sphi %s705_s20, %s894_s20   ;;  %s658_s19 = sphi %s703_s19, %s893_s19   ;;  %s654_s18 = sphi %s701_s18, %s892_s18  }
   0x4   : > { %s726_s24 = sadd.s32 1, %s666_s21   ;;  %s135_s25 = sadd.s32 1, %s662_s20 }
   0x5   : > { %s132_s26 = ssub.s32 %s666_s21, %s726_s24  ;;  %p145_p0 = scmp.ne.s32.totalorder %s662_s20, %s658_s19 }
   0x6   : > { %p133_p1 = scmp.eq.s32.totalorder %s132_s26, 0  ;;  %p146_p2 = scmp.eq.s32.totalorder %s722_s22, 1 }
   0x7   : > { %p151_p3 = scmp.ne.s32.totalorder %s658_s19, %s654_s18  ;;  %p152_p4 = scmp.eq.s32.totalorder %s482_s23, 1 }
   0x8   : > { %s737_s27 = scalar_select %p133_p1, %s662_s20, %s135_s25  }
   0x9   : > { %p739_p5 = por %p146_p2, %p145_p0  ;;  %p743_p6 = por %p152_p4, %p151_p3 }
   0xa   : > { %p485_p7 = scmp.ge.s32.totalorder %s666_s21, 1  ;;  %p189_p8 = scmp.lt.s32.totalorder %s666_s21, 3 }
   0xc   : > { %p190_p9 = pnand %p485_p7, %p189_p8 }
   0xd   : > { %p216_p10 = scmp.lt.s32.totalorder (!%p190_p9), %s722_s22, 1  ;;  %s213_s26 = sand.u32 (!%p190_p9), 1, %s658_s19  }
   0xe   : > { %193 = sbr.rel (%p190_p9) target bundleno = 459 (0x1cb), region = 40  ;;  %s486_s30 = sshll.u32 (!%p190_p9), %s213_s26, 3 }
   0xf   : > { %s492_s8 = sshll.u32 (!%p190_p9), %s722_s22, 7  ;;  %s410_s14 = scalar_lea.sflag (!%p190_p9), [#allocation3], %s213_s26 }
  0x10   : > { %s848_s13 = scalar_lea.hbm (!%p190_p9), %s889_s5, %s492_s8 }
  0x13   : > { %v224_v0 = vld [vmem:[%s885_s1 + $0x18] sm:$0xff]  ;;  %v668_v1 = vmov 0.0   ;;  %v223_v2 = vld [vmem:[%s885_s1 + $0x10] sm:$0xff]  ;;  %vm669_vm0 = vmmov 0   ;;  %s217_s9 = scalar_select %p216_p10, %s722_s22, 1  ;;  %v222_v3 = vld [vmem:[%s885_s1 + $0x8] sm:$0xff] }
  0x14   : > { %517 = vmatprep.subr.mxu0 %v668_v1  ;;  %525 = vmatprep.mubr.msk.f32.mxu0 %vm669_vm0, %v668_v1  ;;  %v221_v4 = vld [vmem:[%s885_s1] sm:$0xff]  ;;  %vm232_vm1 = vcmask 261120   ;;  %v330_v6 = vld [vmem:[%s887_s3 + $0x78] sm:$0xff]  ;;  %v329_v7 = vld [vmem:[%s887_s3 + $0x70] sm:$0xff]  ;;  %s670_s22 = smov [#allocation2]  }
  0x15   : > { %518 = vmatpush3.msra.mxu0 %v224_v0  ;;  %528 = vmatprep.subr.mxu1 %v668_v1  ;;  %s487_s12 = sshll.u32 %s217_s9, 3  ;;  %v328_v8 = vld [vmem:[%s887_s3 + $0x68] sm:$0xff]  ;;  %v327_v9 = vld [vmem:[%s887_s3 + $0x60] sm:$0xff]  ;;  %v326_v10 = vld [vmem:[%s887_s3 + $0x58] sm:$0xff]  ;;  %s215_s9 = scalar_lea.vmem [#allocation2], %s486_s30 }
  0x16   : > { %519 = vmatprep.subr.mxu0 %v668_v1  ;;  %560 = vmatprep.mubr.msk.f32.mxu1 %vm669_vm0, %v668_v1  ;;  %s219_s17 = scalar_lea.vmem %s884_s0, %s487_s12  ;;  %v325_v11 = vld [vmem:[%s887_s3 + $0x50] sm:$0xff]  ;;  %v324_v12 = vld [vmem:[%s887_s3 + $0x48] sm:$0xff]  ;;  %v323_v13 = vld [vmem:[%s887_s3 + $0x40] sm:$0xff]  ;;  %s423_s10 = sshll.u32 %s215_s9, 4  ;;  %s424_s10 = int_to_ptr.vmem [resolvable:$true] %s423_s10 }
  0x17   : > { %520 = vmatpush3.msra.mxu0 %v223_v2  ;;  %v220_v5 = vld [vmem:[%s219_s17] sm:$0xff]  ;;  %529 = vmatpush3.msra.mxu1 %v330_v6  ;;  %v322_v14 = vld [vmem:[%s887_s3 + $0x38] sm:$0xff]  ;;  %v321_v15 = vld [vmem:[%s887_s3 + $0x30] sm:$0xff]  ;;  %s606_s15 = scalar_lea.vmem %s424_s10, 128  ;;  %s610_s16 = sshll.u32 %s670_s22, 4  ;;  %s611_s16 = int_to_ptr.vmem [resolvable:$false] %s610_s16 }
  0x18   : > { %521 = vmatprep.subr.mxu0 %v668_v1  ;;  %530 = vmatprep.subr.mxu1 %v668_v1  ;;  %v320_v16 = vld [vmem:[%s887_s3 + $0x28] sm:$0xff]  ;;  %v319_v17 = vld [vmem:[%s887_s3 + $0x20] sm:$0xff]  ;;  %v318_v18 = vld [vmem:[%s887_s3 + $0x18] sm:$0xff]  ;;  %p607_p11 = scmp.ne.s32.totalorder %s424_s10, %s606_s15  ;;  %s612_s17 = scalar_lea.vmem %s611_s16, 256 }
  0x19   : > { %522 = vmatpush3.msra.mxu0 %v222_v3  ;;  %531 = vmatpush3.msra.mxu1 %v329_v7  ;;  %v317_v19 = vld [vmem:[%s887_s3 + $0x10] sm:$0xff]  ;;  %v316_v20 = vld [vmem:[%s887_s3 + $0x8] sm:$0xff]  ;;  %v315_v21 = vld [vmem:[%s887_s3] sm:$0xff]  ;;  %p613_p0 = scmp.lt.s32.totalorder %s424_s10, %s611_s16  ;;  %p614_p1 = scmp.lt.s32.totalorder %s612_s17, %s606_s15 }
  0x1a   : > { %523 = vmatprep.subr.mxu0 %v668_v1  ;;  %532 = vmatprep.subr.mxu1 %v668_v1  ;;  %v488_v22 = vld [vmem:[%s886_s2] ss:$0 sm:$0xff]  ;;  %p608_p12 = pnand %p607_p11, %p739_p5 }
  0x1b   : > { %524 = vmatpush3.msra.mxu0 %v221_v4  ;;  %533 = vmatpush3.msra.mxu1 %v328_v8  ;;  %v490_v35 = vld [vmem:[%s888_s4] ss:$0 sm:$0xff]  ;;  %p615_p2 = por %p614_p1, %p613_p0 }
  0x1c   : > { %526 = vmatmul.mubr.msk.f32.vlgmr.msra.gmra.mxu0 %vm232_vm1, %v220_v5  ;;  %534 = vmatprep.subr.mxu1 %v668_v1  ;;  %p609_p13 = pneg %p608_p12 }
  0x1d   : > { %535 = vmatpush3.msra.mxu1 %v327_v9 }
  0x1e   : > { %536 = vmatprep.subr.mxu1 %v668_v1  ;;  %p616_p3 = pnand %p615_p2, %p609_p13 }
  0x1f   : > { %537 = vmatpush3.msra.mxu1 %v326_v10 }
  0x20   : > { %538 = vmatprep.subr.mxu1 %v668_v1 }
  0x21   : > { %539 = vmatpush3.msra.mxu1 %v325_v11 }
  0x22   : > { %540 = vmatprep.subr.mxu1 %v668_v1 }
  0x23   : > { %541 = vmatpush3.msra.mxu1 %v324_v12 }
  0x24   : > { %542 = vmatprep.subr.mxu1 %v668_v1 }
  0x25   : > { %543 = vmatpush3.msra.mxu1 %v323_v13 }
  0x26   : > { %544 = vmatprep.subr.mxu1 %v668_v1 }
  0x27   : > { %545 = vmatpush3.msra.mxu1 %v322_v14 }
  0x28   : > { %546 = vmatprep.subr.mxu1 %v668_v1 }
  0x29   : > { %547 = vmatpush3.msra.mxu1 %v321_v15 }
  0x2a   : > { %548 = vmatprep.subr.mxu1 %v668_v1 }
  0x2b   : > { %549 = vmatpush3.msra.mxu1 %v320_v16 }
  0x2c   : > { %550 = vmatprep.subr.mxu1 %v668_v1 }
  0x2d   : > { %551 = vmatpush3.msra.mxu1 %v319_v17 }
  0x2e   : > { %552 = vmatprep.subr.mxu1 %v668_v1 }
  0x2f   : > { %553 = vmatpush3.msra.mxu1 %v318_v18 }
  0x30   : > { %554 = vmatprep.subr.mxu1 %v668_v1 }
  0x31   : > { %555 = vmatpush3.msra.mxu1 %v317_v19 }
  0x32   : > { %556 = vmatprep.subr.mxu1 %v668_v1 }
  0x33   : > { %557 = vmatpush3.msra.mxu1 %v316_v20 }
  0x34   : > { %558 = vmatprep.subr.mxu1 %v668_v1 }
  0x35   : > { %559 = vmatpush3.msra.mxu1 %v315_v21 }
  0xdc   : > { %v302_v23 = vpop.f32.mrf.mxu0 }
  0xdd   : > { %v303_v24 = vadd.f32 %v488_v22, %v302_v23 }
  0xde   : > { %v527_v25 = vpop.f32.mrf.mxu0 }
  0xdf   : > { %v307_v26 = vmul.f32 %v303_v24, %v303_v24  ;;  %v306_v32 = vmul.f32 0.5, %v303_v24 }
  0xe1   : > { %v308_v27 = vmul.f32 %v307_v26, %v303_v24 }
  0xe3   : > { %v309_v28 = vmul.f32 0.044715, %v308_v27 }
  0xe5   : > { %v310_v29 = vadd.f32 %v309_v28, %v303_v24 }
  0xe7   : > { %v311_v30 = vmul.f32 0.7978846, %v310_v29 }
  0xe9   : > { %604 = vtanh.f32 %v311_v30 }
  0xf6   : > { %v605_v31 = vpop.eup %604 }
  0xf7   : > { %v313_v33 = vadd.f32 1.0, %v605_v31 }
  0xf9   : > { %v314_v34 = vmul.f32 %v313_v33, %v306_v32 }
  0xfb   : > { %561 = vmatmul.mubr.f32.vlgmr.msra.gmra.mxu1 %v314_v34 }
 0x1bb   : > { %v404_v36 = vpop.f32.mrf.mxu1 }
 0x1bc   : > { %v405_v37 = vadd.f32 %v490_v35, %v404_v36 }
 0x1bd   : > { %v562_v38 = vpop.f32.mrf.mxu1 }
 0x1be   : > { %408 = vst.msk [vmem:[%s215_s9] sm:$0xff] %vm232_vm1, %v405_v37 }
 0x1bf   : > { %619 = shalt.err (!%p616_p3)
}
 0x1c0   : > { %s620_s23 = scalar_lea.hbm %s848_s13, 128  ;;  %s624_s30 = scalar_lea.hbm %s889_s5, 256 }
 0x1c1   : > { %p621_p4 = scmp.ne.s32.totalorder %s848_s13, %s620_s23  ;;  %p625_p9 = scmp.lt.s32.totalorder %s848_s13, %s889_s5 }
 0x1c2   : > { %p626_p10 = scmp.lt.s32.totalorder %s624_s30, %s620_s23 }
 0x1c3   : > { %p622_p7 = pnand %p621_p4, %p739_p5 }
 0x1c4   : > { %p627_p11 = por %p626_p10, %p625_p9 }
 0x1c5   : > { %p623_p8 = pneg %p622_p7 }
 0x1c7   : > { %p628_p12 = pnand %p627_p11, %p623_p8 }
 0x1c9   : > { %631 = shalt.err (!%p628_p12)
}
 0x1ca   : > { %563 = dma.vmem_to_hbm [thread:$0]  (%p739_p5), %s424_s10, 128, %s848_s13, %s410_s14  }
 0x1cb PF: > { %p569_p13 = scmp.ge.s32.totalorder %s666_s21, 2  ;;  %s435_s8 = sand.u32 1, %s654_s18  }
 0x1cc   : > { %s436_s9 = scalar_lea.sflag [#allocation3], %s435_s8 }
 0x1cd   : > { %p566_p0 = pnand %p569_p13, %p743_p6 }
 0x1cf   : > { %p567_p1 = pneg %p566_p0 }
 0x1d1   : > { %649 = dma.done.wait (%p567_p1), %s436_s9, 128  }
 0x1d2   : > { %651 = vsyncadd (%p567_p1), %s436_s9, 4294967168  ;;  %p15_p2 = scmp.ge.s32.totalorder %s726_s24, 4   ;;  %s892_s18 = smov %s658_s19 }
 0x1d3   : > { %s893_s19 = smov %s662_s20  ;;  %s894_s20 = smov %s737_s27 }
 0x1d4   : > { %s895_s21 = smov %s726_s24  ;;  %17 = sbr.rel (!%p15_p2) target bundleno = 3 (0x3), region = 75 }
 0x1d9   :  { %441 = vsyncpa [#allocation3], 1 }
 0x1da   :  { %443 = vsyncpa [#allocation3 + $0x1], 1 }

</bundles_post_ra>
